<compile_context>
chip_gen: v5e
topology: v5e:2x2
jax: 0.10.0
libtpu: 0.0.40
codegen_flags: <defaults>
</compile_context>

<pallas_src>
import math

import jax
import jax.numpy as jnp
from jax.experimental import pallas as pl
from jax.experimental.pallas import tpu as pltpu

BN_EPS = 1e-5
SCALE = float(math.sqrt(0.5))
LANE = 128


def _round_up(n, m):
    return ((n + m - 1) // m) * m


def _make_chain_kernel(first_residual: bool, p_out: int, scale: float = SCALE):
    """Fused GLU-chain kernel; grid = (batch_tile, layer).

    Per layer (all on the current batch tile, which stays resident in the
    f32 output block across the layer axis):
        h      = act_bf16 @ W_bf16            (single MXU dot, [TB, 2*P])
        z      = h * s + t                    (folded training-mode BatchNorm)
        gated  = z[:, :P] * sigmoid(z[:, P:])
        act    = (act + gated) * sqrt(0.5)    (residual; skipped on the very
                                               first GLU when shared layers
                                               exist, per the PyTorch forward)
    """

    def kernel(x_ref, w0_ref, w_ref, bn_ref, out_ref):
        l = pl.program_id(1)
        inv_tb = 1.0 / out_ref.shape[0]

        bnp = bn_ref[...]                       # [8, 2*P] f32 (rows 2..7 pad)
        gamma = bnp[0:1, :]                     # [1, 2*P]
        beta = bnp[1:2, :]                      # [1, 2*P]

        def glu_from_h(h):
            # h: [TB, 2*P] f32; padded feature columns are exactly zero and
            # stay zero through BN (gamma/beta padding is zero).
            mean = jnp.sum(h, axis=0, keepdims=True) * inv_tb
            msq = jnp.sum(h * h, axis=0, keepdims=True) * inv_tb
            var = jnp.maximum(msq - mean * mean, 0.0)      # cancellation guard
            s = gamma * jax.lax.rsqrt(var + BN_EPS)        # EUP
            t = beta - mean * s
            z = h * s + t
            return z[:, :p_out] * jax.nn.sigmoid(z[:, p_out:])   # EUP sigmoid

        @pl.when(l == 0)
        def _():
            h0 = jnp.dot(x_ref[...].astype(jnp.bfloat16), w0_ref[...],
                         preferred_element_type=jnp.float32)       # [TB, 2*P]
            gated = glu_from_h(h0)
            if first_residual:
                # shared == [] path: PyTorch adds the residual to the first
                # independent GLU too (requires inp_dim == out_dim).
                x32 = x_ref[...].astype(jnp.float32)
                out_ref[...] = ((x32 + gated) * scale).astype(out_ref.dtype)
            else:
                out_ref[...] = gated.astype(out_ref.dtype)

        @pl.when(l > 0)
        def _():
            act = out_ref[...]                                      # f32 [TB, P]
            h = jnp.dot(act.astype(jnp.bfloat16), w_ref[...],
                        preferred_element_type=jnp.float32)         # [TB, 2*P]
            gated = glu_from_h(h)
            out_ref[...] = ((act + gated) * scale).astype(out_ref.dtype)

    return kernel


def feature_transformer_forward(x, shared_params, independ_params, vbs=1024):
    """FeatureTransformer.forward (training-mode BN).

    shared_params / independ_params: lists of (W, b, gamma, beta) in PyTorch
    layout: W [2*out_dim, inp], b/gamma/beta [2*out_dim].  The bias b is
    dropped (exactly cancelled by training-mode BN mean subtraction).
    """
    params = list(shared_params) + list(independ_params)
    assert params, "FeatureTransformer needs at least one GLU"

    B, inp_dim = x.shape
    out_dim = params[0][0].shape[0] // 2
    L = len(params)
    first_residual = (len(shared_params) == 0)
    if first_residual:
        assert inp_dim == out_dim, (
            "shared=[] requires inp_dim == out_dim (residual on first GLU)")

    K = _round_up(inp_dim, LANE)        # layer-0 contraction width
    P = _round_up(out_dim, LANE)        # resident activation / output width

    # Batch tiling == Ghost-BatchNorm chunks (per-tile BN statistics).
    TB = B if B <= vbs else vbs
    assert B % TB == 0, "TODO(synk): ragged GBN chunks (B % vbs != 0)"
    n_bt = B // TB

    # --- wrapper-side packing: transpose, concat lin|gate halves, pad -------
    w0 = jnp.zeros((K, 2 * P), jnp.float32)            # layer 0 only
    w_rest = jnp.zeros((L, P, 2 * P), jnp.float32)     # index 0 = unused dummy
    bn = jnp.zeros((L, 8, 2 * P), jnp.float32)         # row 0 gamma, row 1 beta
    for i, (w, _b, gamma, beta) in enumerate(params):
        od = w.shape[0] // 2
        assert od == out_dim
        inp_i = w.shape[1]
        w_lin = w[:od, :].T                            # [inp_i, od]
        w_gate = w[od:, :].T                           # [inp_i, od]
        if i == 0:
            assert inp_i == inp_dim
            w0 = w0.at[:inp_i, :od].set(w_lin)
            w0 = w0.at[:inp_i, P:P + od].set(w_gate)
        else:
            assert inp_i == out_dim
            w_rest = w_rest.at[i, :inp_i, :od].set(w_lin)
            w_rest = w_rest.at[i, :inp_i, P:P + od].set(w_gate)
        bn = bn.at[i, 0, :od].set(gamma[:od])
        bn = bn.at[i, 0, P:P + od].set(gamma[od:])
        bn = bn.at[i, 1, :od].set(beta[:od])
        bn = bn.at[i, 1, P:P + od].set(beta[od:])

    w0 = w0.astype(jnp.bfloat16)                       # MXU-native operands
    w_rest = w_rest.astype(jnp.bfloat16)
    x_pad = jnp.zeros((B, K), jnp.float32).at[:, :inp_dim].set(
        x.astype(jnp.float32))

    kernel = _make_chain_kernel(first_residual, P)

    # Footprint-based scoped-VMEM limit: blocks x2 (double buffer) + headroom
    # for in-kernel [TB, 2*P] f32 temporaries.
    blk_bytes = (TB * K * 4            # x block
                 + K * 2 * P * 2       # layer-0 weight (bf16)
                 + P * 2 * P * 2       # per-layer weight (bf16)
                 + 8 * 2 * P * 4       # gamma/beta block
                 + TB * P * 4)         # output/accumulator block
    vmem_est = 2 * blk_bytes + 4 * TB * 2 * P * 4
    vmem_limit = int(min(128 * 1024 * 1024,
                         max(32 * 1024 * 1024, 2 * vmem_est)))

    out_pad = pl.pallas_call(
        kernel,
        out_shape=jax.ShapeDtypeStruct((B, P), jnp.float32),
        grid_spec=pltpu.PrefetchScalarGridSpec(
            num_scalar_prefetch=0,
            grid=(n_bt, L),                                    # (batch, layer)
            in_specs=[
                pl.BlockSpec((TB, K), lambda b, l: (b, 0)),          # x (l==0)
                pl.BlockSpec((K, 2 * P), lambda b, l: (0, 0)),       # W layer 0
                pl.BlockSpec((None, P, 2 * P), lambda b, l: (l, 0, 0)),  # W[l]
                pl.BlockSpec((None, 8, 2 * P), lambda b, l: (l, 0, 0)),  # BN[l]
            ],
            out_specs=pl.BlockSpec((TB, P), lambda b, l: (b, 0)),    # resident
        ),
        compiler_params=pltpu.CompilerParams(
            dimension_semantics=("parallel", "arbitrary"),
            vmem_limit_bytes=vmem_limit,
        ),
    )(x_pad, w0, w_rest, bn)

    return out_pad[:, :out_dim].astype(x.dtype)


# ----------------------------- pure-JAX reference ---------------------------
def _glu_ref(x, w, b, gamma, beta):
    h = x @ w.T + b
    mean = jnp.mean(h, axis=0, keepdims=True)
    var = jnp.mean((h - mean) ** 2, axis=0, keepdims=True)
    h = (h - mean) / jnp.sqrt(var + BN_EPS) * gamma + beta
    od = w.shape[0] // 2
    return h[:, :od] * jax.nn.sigmoid(h[:, od:])


def _feature_transformer_ref(x, shared_params, independ_params):
    if shared_params:
        x = _glu_ref(x, *shared_params[0])
        for p in shared_params[1:]:
            x = (x + _glu_ref(x, *p)) * SCALE
    for p in independ_params:
        x = (x + _glu_ref(x, *p)) * SCALE
    return x


def _init_glu_params(key, inp_dim, out_dim):
    """Deterministic init matching nn.Linear + fresh nn.BatchNorm1d."""
    kw, kb = jax.random.split(key)
    bound = 1.0 / math.sqrt(inp_dim)
    w = jax.random.uniform(kw, (2 * out_dim, inp_dim), jnp.float32,
                           minval=-bound, maxval=bound)
    b = jax.random.uniform(kb, (2 * out_dim,), jnp.float32,
                           minval=-bound, maxval=bound)
    gamma = jnp.ones((2 * out_dim,), jnp.float32)
    beta = jnp.zeros((2 * out_dim,), jnp.float32)
    return (w, b, gamma, beta)


if __name__ == "__main__":
    # Small, module-consistent shapes (batch <= vbs so GBN == one BatchNorm).
    # For real MXU utilization use B >= 128; kept small per the demo contract.
    B, INP_DIM, OUT_DIM = 8, 16, 16
    N_SHARED, N_IND = 2, 2

    key = jax.random.PRNGKey(0)
    keys = jax.random.split(key, 1 + N_SHARED + N_IND)

    x = jax.random.normal(keys[0], (B, INP_DIM), jnp.float32)

    shared_params = []
    for i in range(N_SHARED):
        inp = INP_DIM if i == 0 else OUT_DIM
        shared_params.append(_init_glu_params(keys[1 + i], inp, OUT_DIM))

    independ_params = []
    for i in range(N_IND):
        # shared non-empty -> all independent GLUs are Linear(out_dim, 2*out_dim)
        independ_params.append(
            _init_glu_params(keys[1 + N_SHARED + i], OUT_DIM, OUT_DIM))

    out = feature_transformer_forward(x, shared_params, independ_params,
                                      vbs=1024)
    out = jax.block_until_ready(out)
    assert out.shape == (B, OUT_DIM)
    assert bool(jnp.all(jnp.isfinite(out)))

    ref = _feature_transformer_ref(x, shared_params, independ_params)
    max_err = float(jnp.max(jnp.abs(out - ref)))
    # Kernel feeds bf16 operands to the MXU (per perf review); reference is
    # pure f32, so the tolerance is bf16-matmul-sized on O(1) activations.
    assert max_err < 5e-2, f"mismatch vs reference: max abs err {max_err}"

    print("KERNEL_OK")
</pallas_src>

<mosaic_0001>
module attributes {stable_mosaic.version = 11 : i64} {
  func.func @kernel(%arg0: i32, %arg1: i32, %arg2: memref<8x128xf32, #tpu.memory_space<vmem>>, %arg3: memref<128x256xbf16, #tpu.memory_space<vmem>>, %arg4: memref<1x128x256xbf16, #tpu.memory_space<vmem>>, %arg5: memref<1x8x256xf32, #tpu.memory_space<vmem>>, %arg6: memref<8x128xf32, #tpu.memory_space<vmem>>) attributes {dimension_semantics = [#tpu.dimension_semantics<parallel>, #tpu.dimension_semantics<arbitrary>], iteration_bounds = array<i64: 1, 4>, scalar_prefetch = 0 : i64, scratch_operands = 0 : i64, tpu.core_type = #tpu.core_type<tc>, window_params = [{transform_indices = @transform_0, window_bounds = array<i64: 8, 128>}, {pipeline_mode = #tpu.pipeline_mode<synchronous>, transform_indices = @transform_1, window_bounds = array<i64: 128, 256>}, {transform_indices = @transform_2, window_bounds = array<i64: 1, 128, 256>}, {transform_indices = @transform_3, window_bounds = array<i64: 1, 8, 256>}, {transform_indices = @transform_4, window_bounds = array<i64: 8, 128>}]} {
    %c0 = arith.constant 0 : index
    %c0_0 = arith.constant 0 : index
    %c0_1 = arith.constant 0 : index
    %0 = vector.load %arg5[%c0, %c0_0, %c0_1] : memref<1x8x256xf32, #tpu.memory_space<vmem>>, vector<1x8x256xf32>
    %1 = vector.shape_cast %0 : vector<1x8x256xf32> to vector<8x256xf32>
    %2 = vector.extract_strided_slice %1 {offsets = [0, 0], sizes = [1, 256], strides = [1, 1]} : vector<8x256xf32> to vector<1x256xf32>
    %3 = vector.extract_strided_slice %1 {offsets = [1, 0], sizes = [1, 256], strides = [1, 1]} : vector<8x256xf32> to vector<1x256xf32>
    %c0_i32 = arith.constant 0 : i32
    %4 = arith.cmpi eq, %arg1, %c0_i32 : i32
    %5 = arith.extui %4 : i1 to i32
    %c0_i32_2 = arith.constant 0 : i32
    %6 = arith.cmpi ne, %5, %c0_i32_2 : i32
    scf.if %6 {
      %c0_5 = arith.constant 0 : index
      %c0_6 = arith.constant 0 : index
      %10 = vector.load %arg2[%c0_5, %c0_6] : memref<8x128xf32, #tpu.memory_space<vmem>>, vector<8x128xf32>
      %11 = arith.truncf %10 : vector<8x128xf32> to vector<8x128xbf16>
      %c0_7 = arith.constant 0 : index
      %c0_8 = arith.constant 0 : index
      %12 = vector.load %arg3[%c0_7, %c0_8] : memref<128x256xbf16, #tpu.memory_space<vmem>>, vector<128x256xbf16>
      %cst = arith.constant dense<0.000000e+00> : vector<8x256xf32>
      %13 = tpu.matmul %11, %12, %cst {dimension_numbers = #tpu.dot_dimension_numbers<[1], [0], [0], [1], [0, 0, 1, 1], [], []>} : vector<8x128xbf16>, vector<128x256xbf16>, vector<8x256xf32> -> vector<8x256xf32>
      %cst_9 = arith.constant dense<0.000000e+00> : vector<256xf32>
      %14 = vector.multi_reduction <add>, %13, %cst_9 [0] : vector<8x256xf32> to vector<256xf32>
      %15 = vector.shape_cast %14 : vector<256xf32> to vector<1x256xf32>
      %cst_10 = arith.constant 1.250000e-01 : f32
      %16 = vector.broadcast %cst_10 : f32 to vector<1x256xf32>
      %17 = arith.mulf %15, %16 : vector<1x256xf32>
      %18 = arith.mulf %13, %13 : vector<8x256xf32>
      %cst_11 = arith.constant dense<0.000000e+00> : vector<256xf32>
      %19 = vector.multi_reduction <add>, %18, %cst_11 [0] : vector<8x256xf32> to vector<256xf32>
      %20 = vector.shape_cast %19 : vector<256xf32> to vector<1x256xf32>
      %cst_12 = arith.constant 1.250000e-01 : f32
      %21 = vector.broadcast %cst_12 : f32 to vector<1x256xf32>
      %22 = arith.mulf %20, %21 : vector<1x256xf32>
      %23 = arith.mulf %17, %17 : vector<1x256xf32>
      %24 = arith.subf %22, %23 : vector<1x256xf32>
      %cst_13 = arith.constant 0.000000e+00 : f32
      %25 = vector.broadcast %cst_13 : f32 to vector<1x256xf32>
      %26 = arith.maximumf %24, %25 : vector<1x256xf32>
      %cst_14 = arith.constant 9.99999974E-6 : f32
      %27 = vector.broadcast %cst_14 : f32 to vector<1x256xf32>
      %28 = arith.addf %26, %27 : vector<1x256xf32>
      %29 = math.rsqrt %28 : vector<1x256xf32>
      %30 = arith.mulf %2, %29 : vector<1x256xf32>
      %31 = arith.mulf %17, %30 : vector<1x256xf32>
      %32 = arith.subf %3, %31 : vector<1x256xf32>
      %33 = vector.broadcast %30 : vector<1x256xf32> to vector<8x256xf32>
      %34 = arith.mulf %13, %33 : vector<8x256xf32>
      %35 = vector.broadcast %32 : vector<1x256xf32> to vector<8x256xf32>
      %36 = arith.addf %34, %35 : vector<8x256xf32>
      %37 = vector.extract_strided_slice %36 {offsets = [0, 0], sizes = [8, 128], strides = [1, 1]} : vector<8x256xf32> to vector<8x128xf32>
      %38 = vector.extract_strided_slice %36 {offsets = [0, 128], sizes = [8, 128], strides = [1, 1]} : vector<8x256xf32> to vector<8x128xf32>
      %39 = arith.negf %38 : vector<8x128xf32>
      %40 = math.exp %39 : vector<8x128xf32>
      %cst_15 = arith.constant 1.000000e+00 : f32
      %41 = vector.broadcast %cst_15 : f32 to vector<8x128xf32>
      %42 = arith.addf %41, %40 : vector<8x128xf32>
      %43 = arith.divf %41, %42 : vector<8x128xf32>
      %44 = arith.mulf %37, %43 : vector<8x128xf32>
      %c0_16 = arith.constant 0 : index
      %c0_17 = arith.constant 0 : index
      %45 = vector.load %arg6[%c0_16, %c0_17] : memref<8x128xf32, #tpu.memory_space<vmem>>, vector<8x128xf32>
      tpu.vector_store %arg6[%c0_16, %c0_17], %44 {strides = array<i32>} : memref<8x128xf32, #tpu.memory_space<vmem>>, vector<8x128xf32>,
    } else {
    }
    %c0_i32_3 = arith.constant 0 : i32
    %7 = arith.cmpi sgt, %arg1, %c0_i32_3 : i32
    %8 = arith.extui %7 : i1 to i32
    %c0_i32_4 = arith.constant 0 : i32
    %9 = arith.cmpi ne, %8, %c0_i32_4 : i32
    scf.if %9 {
      %c0_5 = arith.constant 0 : index
      %c0_6 = arith.constant 0 : index
      %10 = vector.load %arg6[%c0_5, %c0_6] : memref<8x128xf32, #tpu.memory_space<vmem>>, vector<8x128xf32>
      %11 = arith.truncf %10 : vector<8x128xf32> to vector<8x128xbf16>
      %c0_7 = arith.constant 0 : index
      %c0_8 = arith.constant 0 : index
      %c0_9 = arith.constant 0 : index
      %12 = vector.load %arg4[%c0_7, %c0_8, %c0_9] : memref<1x128x256xbf16, #tpu.memory_space<vmem>>, vector<1x128x256xbf16>
      %13 = vector.shape_cast %12 : vector<1x128x256xbf16> to vector<128x256xbf16>
      %cst = arith.constant dense<0.000000e+00> : vector<8x256xf32>
      %14 = tpu.matmul %11, %13, %cst {dimension_numbers = #tpu.dot_dimension_numbers<[1], [0], [0], [1], [0, 0, 1, 1], [], []>} : vector<8x128xbf16>, vector<128x256xbf16>, vector<8x256xf32> -> vector<8x256xf32>
      %cst_10 = arith.constant dense<0.000000e+00> : vector<256xf32>
      %15 = vector.multi_reduction <add>, %14, %cst_10 [0] : vector<8x256xf32> to vector<256xf32>
      %16 = vector.shape_cast %15 : vector<256xf32> to vector<1x256xf32>
      %cst_11 = arith.constant 1.250000e-01 : f32
      %17 = vector.broadcast %cst_11 : f32 to vector<1x256xf32>
      %18 = arith.mulf %16, %17 : vector<1x256xf32>
      %19 = arith.mulf %14, %14 : vector<8x256xf32>
      %cst_12 = arith.constant dense<0.000000e+00> : vector<256xf32>
      %20 = vector.multi_reduction <add>, %19, %cst_12 [0] : vector<8x256xf32> to vector<256xf32>
      %21 = vector.shape_cast %20 : vector<256xf32> to vector<1x256xf32>
      %cst_13 = arith.constant 1.250000e-01 : f32
      %22 = vector.broadcast %cst_13 : f32 to vector<1x256xf32>
      %23 = arith.mulf %21, %22 : vector<1x256xf32>
      %24 = arith.mulf %18, %18 : vector<1x256xf32>
      %25 = arith.subf %23, %24 : vector<1x256xf32>
      %cst_14 = arith.constant 0.000000e+00 : f32
      %26 = vector.broadcast %cst_14 : f32 to vector<1x256xf32>
      %27 = arith.maximumf %25, %26 : vector<1x256xf32>
      %cst_15 = arith.constant 9.99999974E-6 : f32
      %28 = vector.broadcast %cst_15 : f32 to vector<1x256xf32>
      %29 = arith.addf %27, %28 : vector<1x256xf32>
      %30 = math.rsqrt %29 : vector<1x256xf32>
      %31 = arith.mulf %2, %30 : vector<1x256xf32>
      %32 = arith.mulf %18, %31 : vector<1x256xf32>
      %33 = arith.subf %3, %32 : vector<1x256xf32>
      %34 = vector.broadcast %31 : vector<1x256xf32> to vector<8x256xf32>
      %35 = arith.mulf %14, %34 : vector<8x256xf32>
      %36 = vector.broadcast %33 : vector<1x256xf32> to vector<8x256xf32>
      %37 = arith.addf %35, %36 : vector<8x256xf32>
      %38 = vector.extract_strided_slice %37 {offsets = [0, 0], sizes = [8, 128], strides = [1, 1]} : vector<8x256xf32> to vector<8x128xf32>
      %39 = vector.extract_strided_slice %37 {offsets = [0, 128], sizes = [8, 128], strides = [1, 1]} : vector<8x256xf32> to vector<8x128xf32>
      %40 = arith.negf %39 : vector<8x128xf32>
      %41 = math.exp %40 : vector<8x128xf32>
      %cst_16 = arith.constant 1.000000e+00 : f32
      %42 = vector.broadcast %cst_16 : f32 to vector<8x128xf32>
      %43 = arith.addf %42, %41 : vector<8x128xf32>
      %44 = arith.divf %42, %43 : vector<8x128xf32>
      %45 = arith.mulf %38, %44 : vector<8x128xf32>
      %46 = arith.addf %10, %45 : vector<8x128xf32>
      %cst_17 = arith.constant 0.707106769 : f32
      %47 = vector.broadcast %cst_17 : f32 to vector<8x128xf32>
      %48 = arith.mulf %46, %47 : vector<8x128xf32>
      %c0_18 = arith.constant 0 : index
      %c0_19 = arith.constant 0 : index
      %49 = vector.load %arg6[%c0_18, %c0_19] : memref<8x128xf32, #tpu.memory_space<vmem>>, vector<8x128xf32>
      tpu.vector_store %arg6[%c0_18, %c0_19], %48 {strides = array<i32>} : memref<8x128xf32, #tpu.memory_space<vmem>>, vector<8x128xf32>,
    } else {
    }
    return
  }
  func.func @transform_0(%arg0: i32, %arg1: i32) -> (i32, i32) {
    %c0_i32 = arith.constant 0 : i32
    %c0_i32_0 = arith.constant 0 : i32
    return %arg0, %c0_i32 : i32, i32
  }
  func.func @transform_1(%arg0: i32, %arg1: i32) -> (i32, i32) {
    %c0_i32 = arith.constant 0 : i32
    %c0_i32_0 = arith.constant 0 : i32
    %c0_i32_1 = arith.constant 0 : i32
    return %c0_i32, %c0_i32_0 : i32, i32
  }
  func.func @transform_2(%arg0: i32, %arg1: i32) -> (i32, i32, i32) {
    %c0_i32 = arith.constant 0 : i32
    %c0_i32_0 = arith.constant 0 : i32
    %c0_i32_1 = arith.constant 0 : i32
    return %arg1, %c0_i32, %c0_i32_0 : i32, i32, i32
  }
  func.func @transform_3(%arg0: i32, %arg1: i32) -> (i32, i32, i32) {
    %c0_i32 = arith.constant 0 : i32
    %c0_i32_0 = arith.constant 0 : i32
    %c0_i32_1 = arith.constant 0 : i32
    return %arg1, %c0_i32, %c0_i32_0 : i32, i32, i32
  }
  func.func @transform_4(%arg0: i32, %arg1: i32) -> (i32, i32) {
    %c0_i32 = arith.constant 0 : i32
    %c0_i32_0 = arith.constant 0 : i32
    return %arg0, %c0_i32 : i32, i32
  }
}

</mosaic_0001>

<bundles_post_ra>
// kernel: tpu_custom_call.1
= control target key start
LH: loop header
LB: loop body
LE: loop exit
PB: predicated region body
PF: predicated region fallthrough
CT: control target
= control target key end

     0   :  { %s1608_s0 = inlined_call_operand.hbm [shape: f32[8,128], index: 0, kind: input, shape index: {}]   ;;  %s1609_s1 = inlined_call_operand.hbm [shape: bf16[128,256], index: 1, kind: input, shape index: {}]   ;;  %s1610_s2 = inlined_call_operand.hbm [shape: bf16[4,128,256], index: 2, kind: input, shape index: {}]   ;;  %s1611_s3 = inlined_call_operand.hbm [shape: f32[4,8,256], index: 3, kind: input, shape index: {}]   ;;  %s1612_s4 = inlined_call_operand.hbm [shape: f32[8,128], index: 4, kind: output, shape index: {}]  }
   0x1   :  { %1614 = sst [smem:[#allocation16_spill]] %s1608_s0 }
   0x2   :  { %1615 = sst [smem:[#allocation17_spill]] %s1610_s2 }
   0x3   :  { %9 = vsyncpa [#allocation3], 0 }
   0x4   :  { %10 = vsyncpa [#allocation6], 0 }
   0x5   :  { %11 = vsyncpa [#allocation4], 0  ;;  %s1401_s15 = smov 0   ;;  %s1403_s16 = smov 0  }
   0x6   :  { %s1405_s17 = smov 0   ;;  %s1407_s18 = smov 0  }
   0x7   :  { %s1409_s19 = smov 0   ;;  %s1411_s20 = smov 0  }
   0x8 LB: > { %s1430_s21 = sadd.s32 4294967295, %s1369_s20   ;;  %s83_s22 = sadd.s32 1, %s1357_s17  ;;  %s1369_s20 = sphi %s1411_s20, %s17_s20   ;;  %s1365_s19 = sphi %s1409_s19, %s1631_s19   ;;  %s1361_s18 = sphi %s1407_s18, %s1630_s18   ;;  %s1357_s17 = sphi %s1405_s17, %s1629_s17   ;;  %s1353_s16 = sphi %s1403_s16, %s1628_s16   ;;  %s1349_s15 = sphi %s1401_s15, %s1627_s15  }
   0x9   : > { %p90_p0 = scmp.ne.s32.totalorder %s1357_s17, %s1353_s16  ;;  %p91_p1 = scmp.eq.s32.totalorder %s1369_s20, 0 }
   0xa   : > { %p96_p2 = scmp.ne.s32.totalorder %s1353_s16, %s1349_s15  ;;  %p97_p3 = scmp.eq.s32.totalorder %s1430_s21, 0 }
   0xb   : > { %p1438_p4 = por %p91_p1, %p90_p0  ;;  %p868_p5 = scmp.ge.s32.totalorder %s1369_s20, 1 }
   0xc   : > { %p1445_p6 = por %p97_p3, %p96_p2  ;;  %p159_p7 = scmp.lt.s32.totalorder %s1369_s20, 5 }
   0xd   : > { %s1618_s0 = sld [smem:[#allocation16_spill]]  ;;  %s1371_s29 = smov [#allocation2]  }
   0xe   : > { %p1453_p8 = pnand %p868_p5, %p159_p7  ;;  %s175_s30 = sshll.u32 %s1371_s29, 4  ;;  %s176_s30 = int_to_ptr.vmem [resolvable:$true] %s175_s30 }
   0xf   : > { %p1085_p10 = scmp.lt.s32.totalorder %s1369_s20, 4  ;;  %s26_s7 = sadd.s32 1, %s1365_s19 }
  0x10   : > { %p1069_p9 = pneg %p1453_p8  ;;  %p27_p13 = scmp.ge.s32.totalorder %s26_s7, 4 }
  0x11   : > { %p1468_p12 = pnand %p1085_p10, %p1438_p4  ;;  %s200_s8 = sand.u32 1, %s1369_s20  }
  0x12   : > { %p1462_p11 = pnand %p1069_p9, %p97_p3  ;;  %s1633_s7 = smov (%p27_p13, %s26_s7), 0 }
  0x13   : > { %s173_s27 = sshll.u32 %s1618_s0, 4  ;;  %1622 = sst [smem:[#allocation14_spill]] %s1633_s7  ;;  %s174_s27 = int_to_ptr.hbm [resolvable:$true] %s173_s27 }
  0x14   : > { %1072 = dma.hbm_to_vmem [thread:$0]  (!%p1462_p11), %s174_s27, 128, %s176_s30, [#allocation3]  }
  0x15   : > { %s202_s9 = sand.u32 1, %s1357_s17   ;;  %s80_s10 = ssub.s32 %s1365_s19, %s1633_s7 }
  0x16   : > { %p81_p0 = scmp.eq.s32.totalorder %s80_s10, 0  ;;  %s872_s11 = sshll.u32 %s202_s9, 7 }
  0x17   : > { %s1019_s12 = sshll.u32 %s1365_s19, 7  ;;  %s1624_s2 = sld [smem:[#allocation17_spill]] }
  0x18   : > { %s1485_s13 = scalar_select %p81_p0, %s1357_s17, %s83_s22  }
  0x19   : > { %s204_s25 = scalar_lea.vmem [#allocation7], %s872_s11  ;;  %s184_s10 = sshll.u32 %s1609_s1, 4  ;;  %s185_s10 = int_to_ptr.hbm [resolvable:$true] %s184_s10 }
  0x1a   : > { %1623 = sst [smem:[#allocation15_spill]] %s1485_s13  ;;  %s212_s26 = sshll.u32 %s204_s25, 4  ;;  %s213_s26 = int_to_ptr.vmem [resolvable:$true] %s212_s26 }
  0x1b   : > { %s201_s0 = scalar_lea.sflag [#allocation3], %s200_s8  ;;  %s1372_s7 = smov 128  }
  0x1c   : > { %s1373_s22 = smov 8   ;;  %s1374_s14 = smov [#allocation5]  }
  0x1d   : > { %s209_s23 = scalar_lea.hbm %s1624_s2, %s1019_s12  ;;  %s186_s12 = sshll.u32 %s1374_s14, 4  ;;  %s187_s12 = int_to_ptr.vmem [resolvable:$true] %s186_s12 }
  0x1e   : > { %s210_s27 = sshll.u32 %s209_s23, 4  ;;  %s875_s15 = sshll.u32 %s202_s9, 4  ;;  %s211_s27 = int_to_ptr.hbm [resolvable:$true] %s210_s27 }
  0x1f   : > { %1079 = dma.hbm_to_vmem [thread:$0]  (!%p1468_p12), %s211_s27, 2048, %s213_s26, %s201_s0, %s1372_s7, %s1372_s7, %s1373_s22  }
  0x20   : > { %1075 = dma.hbm_to_vmem [thread:$0]  (!%p1462_p11), %s185_s10, 2048, %s187_s12, [#allocation6], %s1372_s7, %s1372_s7, %s1373_s22  }
  0x21   : > { %s1020_s11 = sshll.u32 %s1365_s19, 4  ;;  %s226_s23 = scalar_lea.vmem [#allocation8], %s875_s15 }
  0x22   : > { %s235_s25 = sshll.u32 %s226_s23, 4  ;;  %s231_s29 = scalar_lea.hbm %s1611_s3, %s1020_s11  ;;  %s236_s25 = int_to_ptr.vmem [resolvable:$true] %s235_s25 }
  0x23   : > { %s233_s8 = sshll.u32 %s231_s29, 4  ;;  %244 = sbr.rel (%p1453_p8) target bundleno = 559 (0x22f), region = 36  ;;  %s234_s8 = int_to_ptr.hbm [resolvable:$true] %s233_s8 }
  0x24   : > { %1082 = dma.hbm_to_vmem [thread:$0]  (!%p1468_p12), %s234_s8, 256, %s236_s25, %s201_s0  }
  0x28   : > { %1332 = dma.done.wait (%p97_p3), [#allocation3], 128  }
  0x29   : > { %1334 = vsyncadd (%p97_p3), [#allocation3], 4294967168 }
  0x2a   : > { %1336 = dma.done.wait (%p97_p3), [#allocation6], 2048  }
  0x2b   : > { %1338 = vsyncadd (%p97_p3), [#allocation6], 4294965248  ;;  %s256_s2 = sand.u32 1, %s1430_s21   ;;  %s258_s0 = sand.u32 1, %s1353_s16  }
  0x2c   : > { %s881_s5 = sshll.u32 %s258_s0, 7  ;;  %s257_s28 = scalar_lea.sflag [#allocation3], %s256_s2 }
  0x2d   : > { %s1515_s6 = scalar_lea.vmem [#allocation7], %s881_s5 }
  0x2e   : > { %1340 = dma.done.wait (%p1445_p6), %s257_s28, 2304  }
  0x2f   : > { %1342 = vsyncadd (%p1445_p6), %s257_s28, 4294964992  ;;  %s882_s7 = sshll.u32 %s258_s0, 4  ;;  %p883_p1 = scmp.ne.s32.totalorder %s1361_s18, 0 }
  0x30   : > { %s270_s9 = scalar_lea.vmem [#allocation8], %s882_s7 }
  0x31   : > { %v1521_v0 = vld [vmem:[%s270_s9] sm:$0xff]  ;;  %v1523_v1 = vld [vmem:[%s270_s9 + $0x8] sm:$0xff]  ;;  %301 = sbr.rel (%p883_p1) target bundleno = 298 (0x12a), region = 56 }
  0x36   : > { %v942_v2 = vld [vmem:[#allocation5 + $0x70] sm:$0xf]  ;;  %v1036_v3 = vld [vmem:[#allocation5 + $0x74] sm:$0xf0]  ;;  %v1035_v4 = vld [vmem:[#allocation5 + $0x74] sm:$0xf] }
  0x37   : > { %v943_v5 = vor.u32 %v1036_v3, %v942_v2  ;;  %v944_v6 = vld [vmem:[#allocation5 + $0x78] sm:$0xf0]  ;;  %v934_v7 = vld [vmem:[#allocation5 + $0x60] sm:$0xf]  ;;  %v1034_v8 = vld [vmem:[#allocation5 + $0x64] sm:$0xf0] }
  0x38   : > { %v947_v9 = vor.u32 %v1035_v4, %v944_v6  ;;  %v1033_v10 = vld [vmem:[#allocation5 + $0x64] sm:$0xf]  ;;  %v936_v11 = vld [vmem:[#allocation5 + $0x68] sm:$0xf0]  ;;  %v935_v12 = vor.u32 %v1034_v8, %v934_v7  ;;  %v926_v14 = vld [vmem:[#allocation5 + $0x50] sm:$0xf] }
  0x39   : > { %400 = vmatpush.bf16.msra.mxu0 %v943_v5  ;;  %v939_v13 = vor.u32 %v1033_v10, %v936_v11  ;;  %v1032_v15 = vld [vmem:[#allocation5 + $0x54] sm:$0xf0]  ;;  %v1031_v16 = vld [vmem:[#allocation5 + $0x54] sm:$0xf]  ;;  %v928_v17 = vld [vmem:[#allocation5 + $0x58] sm:$0xf0] }
  0x3a   : > { %413 = vmatpush.bf16.msra.mxu1 %v947_v9  ;;  %v927_v18 = vor.u32 %v1032_v15, %v926_v14  ;;  %v931_v19 = vor.u32 %v1031_v16, %v928_v17  ;;  %v918_v20 = vld [vmem:[#allocation5 + $0x40] sm:$0xf]  ;;  %v1030_v21 = vld [vmem:[#allocation5 + $0x44] sm:$0xf0]  ;;  %v1029_v22 = vld [vmem:[#allocation5 + $0x44] sm:$0xf] }
  0x3b   : > { %v920_v23 = vld [vmem:[#allocation5 + $0x48] sm:$0xf0]  ;;  %v919_v24 = vor.u32 %v1030_v21, %v918_v20  ;;  %v910_v26 = vld [vmem:[#allocation5 + $0x30] sm:$0xf]  ;;  %v1028_v27 = vld [vmem:[#allocation5 + $0x34] sm:$0xf0] }
  0x3c   : > { %v923_v25 = vor.u32 %v1029_v22, %v920_v23  ;;  %v1027_v28 = vld [vmem:[#allocation5 + $0x34] sm:$0xf]  ;;  %v912_v29 = vld [vmem:[#allocation5 + $0x38] sm:$0xf0]  ;;  %v911_v30 = vor.u32 %v1028_v27, %v910_v26  ;;  %v902_v32 = vld [vmem:[#allocation5 + $0x20] sm:$0xf] }
  0x3d   : > { %401 = vmatpush.bf16.msra.mxu0 %v935_v12  ;;  %v915_v31 = vor.u32 %v1027_v28, %v912_v29  ;;  %v1026_v33 = vld [vmem:[#allocation5 + $0x24] sm:$0xf0]  ;;  %v1025_v34 = vld [vmem:[#allocation5 + $0x24] sm:$0xf]  ;;  %v904_v35 = vld [vmem:[#allocation5 + $0x28] sm:$0xf0] }
  0x3e   : > { %414 = vmatpush.bf16.msra.mxu1 %v939_v13  ;;  %v903_v36 = vor.u32 %v1026_v33, %v902_v32  ;;  %v907_v37 = vor.u32 %v1025_v34, %v904_v35  ;;  %v894_v38 = vld [vmem:[#allocation5 + $0x10] sm:$0xf]  ;;  %v1024_v39 = vld [vmem:[#allocation5 + $0x14] sm:$0xf0]  ;;  %v1023_v40 = vld [vmem:[#allocation5 + $0x14] sm:$0xf] }
  0x3f   : > { %v896_v41 = vld [vmem:[#allocation5 + $0x18] sm:$0xf0]  ;;  %v895_v42 = vor.u32 %v1024_v39, %v894_v38  ;;  %v886_v44 = vld [vmem:[#allocation5] sm:$0xf]  ;;  %v1022_v45 = vld [vmem:[#allocation5 + $0x4] sm:$0xf0] }
  0x40   : > { %v899_v43 = vor.u32 %v1023_v40, %v896_v41  ;;  %v1021_v46 = vld [vmem:[#allocation5 + $0x4] sm:$0xf]  ;;  %v888_v47 = vld [vmem:[#allocation5 + $0x8] sm:$0xf0]  ;;  %v887_v48 = vor.u32 %v1022_v45, %v886_v44  ;;  %v302_v49 = vld [vmem:[#allocation2] sm:$0xff] }
  0x41   : > { %402 = vmatpush.bf16.msra.mxu0 %v927_v18  ;;  %v891_v50 = vor.u32 %v1021_v46, %v888_v47  ;;  %v303_v51 = vpack.c.bf16 %v302_v49, %v302_v49 }
  0x42   : > { %415 = vmatpush.bf16.msra.mxu1 %v931_v19 }
  0x45   : > { %403 = vmatpush.bf16.msra.mxu0 %v919_v24 }
  0x46   : > { %416 = vmatpush.bf16.msra.mxu1 %v923_v25 }
  0x49   : > { %404 = vmatpush.bf16.msra.mxu0 %v911_v30 }
  0x4a   : > { %417 = vmatpush.bf16.msra.mxu1 %v915_v31 }
  0x4d   : > { %405 = vmatpush.bf16.msra.mxu0 %v903_v36 }
  0x4e   : > { %418 = vmatpush.bf16.msra.mxu1 %v907_v37 }
  0x51   : > { %406 = vmatpush.bf16.msra.mxu0 %v895_v42 }
  0x52   : > { %419 = vmatpush.bf16.msra.mxu1 %v899_v43 }
  0x55   : > { %407 = vmatpush.bf16.msra.mxu0 %v887_v48 }
  0x56   : > { %420 = vmatpush.bf16.msra.mxu1 %v891_v50 }
  0x58   : > { %408 = vmatmul.bf16.vlgmr.msra.gmra.mxu0 %v303_v51 }
  0x59   : > { %421 = vmatmul.bf16.vlgmr.msra.gmra.mxu1 %v303_v51 }
  0xd5   : > { %v1526_v52 = vpop.f32.mrf.mxu0 }
  0xd6   : > { %v426_v53 = vrot.slane %v1526_v52, 4  ;;  %v440_v54 = vmul.f32 %v1526_v52, %v1526_v52  ;;  %v422_v55 = vpop.f32.mrf.mxu1 }
  0xd7   : > { %v432_v56 = vrot.slane %v422_v55, 4  ;;  %v441_v57 = vmul.f32 %v422_v55, %v422_v55 }
  0xd8   : > { %v427_v58 = vadd.f32 %v426_v53, %v1526_v52  ;;  %v442_v59 = vrot.slane %v440_v54, 4 }
  0xd9   : > { %v433_v60 = vadd.f32 %v432_v56, %v422_v55  ;;  %v448_v61 = vrot.slane %v441_v57, 4 }
  0xda   : > { %v428_v62 = vrot.slane %v427_v58, 2  ;;  %v443_v63 = vadd.f32 %v442_v59, %v440_v54 }
  0xdb   : > { %v434_v2 = vrot.slane %v433_v60, 2  ;;  %v449_v3 = vadd.f32 %v448_v61, %v441_v57 }
  0xdc   : > { %v429_v4 = vadd.f32 %v428_v62, %v427_v58  ;;  %v444_v5 = vrot.slane %v443_v63, 2 }
  0xdd   : > { %v435_v6 = vadd.f32 %v434_v2, %v433_v60  ;;  %v450_v7 = vrot.slane %v449_v3, 2  ;;  %v411_v8 = vpop.f32.mrf.mxu0 }
  0xde   : > { %v430_v9 = vrot.slane %v429_v4, 1  ;;  %v445_v10 = vadd.f32 %v444_v5, %v443_v63  ;;  %v424_v11 = vpop.f32.mrf.mxu1 }
  0xdf   : > { %v436_v12 = vrot.slane %v435_v6, 1  ;;  %v451_v13 = vadd.f32 %v450_v7, %v449_v3 }
  0xe0   : > { %v431_v14 = vadd.f32 %v430_v9, %v429_v4  ;;  %v446_v15 = vrot.slane %v445_v10, 1 }
  0xe1   : > { %v437_v16 = vadd.f32 %v436_v12, %v435_v6  ;;  %v452_v17 = vrot.slane %v451_v13, 1 }
  0xe2   : > { %v438_v18 = vmul.f32 0.125, %v431_v14  ;;  %v447_v19 = vadd.f32 %v446_v15, %v445_v10 }
  0xe3   : > { %v439_v20 = vmul.f32 0.125, %v437_v16  ;;  %v453_v21 = vadd.f32 %v452_v17, %v451_v13 }
  0xe4   : > { %v454_v22 = vmul.f32 0.125, %v447_v19  ;;  %v456_v23 = vmul.f32 %v438_v18, %v438_v18 }
  0xe5   : > { %v455_v24 = vmul.f32 0.125, %v453_v21  ;;  %v457_v25 = vmul.f32 %v439_v20, %v439_v20 }
  0xe6   : > { %v458_v26 = vsub.f32 %v454_v22, %v456_v23 }
  0xe7   : > { %v459_v27 = vsub.f32 %v455_v24, %v457_v25 }
  0xe8   : > { %v460_v28 = vmax.f32 %v458_v26, 0.0 }
  0xe9   : > { %v461_v29 = vmax.f32 %v459_v27, 0.0 }
  0xea   : > { %v462_v31 = vadd.f32 1e-05, %v460_v28 }
  0xeb   : > { %v463_v30 = vadd.f32 1e-05, %v461_v29 }
  0xec   : > { %vm470_vm3 = vweird.f32 %v462_v31 }
  0xed   : > { %1143 = vrsqrt.f32 %v463_v30  ;;  %vm480_vm1 = vweird.f32 %v463_v30 }
  0xee   : > { %1145 = vrsqrt.f32 %v462_v31 }
  0xf3   : > { %v1144_v32 = vpop.eup %1143 }
  0xf4   : > { %v475_v33 = vmul.f32 %v1144_v32, %v463_v30  ;;  %v1146_v35 = vpop.eup %1145  ;;  %vm481_vm0 = vweird.f32 %v1144_v32 }
  0xf5   : > { %v465_v37 = vmul.f32 %v1146_v35, %v462_v31  ;;  %vm482_vm2 = vmor %vm480_vm1, %vm481_vm0  ;;  %vm471_vm4 = vweird.f32 %v1146_v35 }
  0xf6   : > { %v476_v34 = vmul.f32 %v1144_v32, %v475_v33  ;;  %vm472_vm5 = vmor %vm470_vm3, %vm471_vm4 }
  0xf7   : > { %v466_v40 = vmul.f32 %v1146_v35, %v465_v37 }
  0xf8   : > { %v477_v36 = vmul.f32 0.5, %v476_v34 }
  0xf9   : > { %v467_v44 = vmul.f32 0.5, %v466_v40 }
  0xfa   : > { %v478_v38 = vsub.f32 1.5, %v477_v36 }
  0xfb   : > { %v468_v48 = vsub.f32 1.5, %v467_v44 }
  0xfc   : > { %v479_v39 = vmul.f32 %v1144_v32, %v478_v38 }
  0xfd   : > { %v469_v53 = vmul.f32 %v1146_v35, %v468_v48 }
  0xfe   : > { %v483_v41 = vsel %vm482_vm2, %v1144_v32, %v479_v39 }
  0xff   : > { %v485_v42 = vmul.f32 %v483_v41, %v1523_v1  ;;  %v473_v56 = vsel %vm472_vm5, %v1146_v35, %v469_v53 }
 0x100   : > { %v484_v57 = vmul.f32 %v473_v56, %v1521_v0 }
 0x101   : > { %v487_v43 = vmul.f32 %v485_v42, %v439_v20  ;;  %v497_v46 = vperm.slane %v485_v42, 0 }
 0x102   : > { %v486_v60 = vmul.f32 %v484_v57, %v438_v18  ;;  %v496_v2 = vperm.slane %v484_v57, 0 }
 0x103   : > { %v491_v45 = vrot.slane %v487_v43, 7  ;;  %v499_v49 = vmul.f32 %v497_v46, %v422_v55 }
 0x104   : > { %v490_v61 = vrot.slane %v486_v60, 7  ;;  %v498_v8 = vmul.f32 %v496_v2, %v1526_v52 }
 0x105   : > { %v495_v47 = vsub.f32 %v1523_v1, %v491_v45 }
 0x106   : > { %v494_v63 = vsub.f32 %v1521_v0, %v490_v61 }
 0x107   : > { %v501_v50 = vperm.slane %v495_v47, 1 }
 0x108   : > { %v500_v5 = vperm.slane %v494_v63, 1 }
 0x109   : > { %v503_v51 = vadd.f32 %v501_v50, %v499_v49 }
 0x10a   : > { %v502_v11 = vadd.f32 %v500_v5, %v498_v8 }
 0x10b   : > { %v948_v54 = vmul.f32 -1.442695, %v503_v51 }
 0x10d   : > { %1147 = vpow2.f32 %v948_v54 }
 0x113   : > { %v1148_v58 = vpop.eup %1147 }
 0x114   : > { %v507_v59 = vadd.f32 1.0, %v1148_v58 }
 0x116   : > { %1149 = vrcp.f32 %v507_v59  ;;  %v519_v4 = vand.u32 2147483648, %v507_v59  ;;  %v517_v7 = vand.u32 2147483647, %v507_v59  ;;  %vm513_vm7 = vweird.f32 %v507_v59 }
 0x118   : > { %v520_v10 = vor.u32 1.1754944e-38, %v519_v4  ;;  %vm518_vm9 = vcmp.eq.f32.partialorder %v517_v7, 8.507059e+37 }
 0x11c   : > { %v1150_v62 = vpop.eup %1149 }
 0x11d   : > { %v509_v55 = vmul.f32 %v1150_v62, %v507_v59  ;;  %vm514_vm6 = vweird.f32 %v1150_v62 }
 0x11e   : > { %vm515_vm8 = vmor %vm513_vm7, %vm514_vm6 }
 0x11f   : > { %v510_v3 = vsub.f32 1.0, %v509_v55 }
 0x121   : > { %v511_v6 = vmul.f32 %v1150_v62, %v510_v3 }
 0x123   : > { %v512_v9 = vadd.f32 %v1150_v62, %v511_v6 }
 0x125   : > { %v516_v12 = vsel %vm515_vm8, %v1150_v62, %v512_v9 }
 0x126   : > { %v521_v13 = vsel %vm518_vm9, %v520_v10, %v516_v12 }
 0x127   : > { %v523_v14 = vmul.f32 %v521_v13, %v502_v11 }
 0x129   : > { %524 = vst [vmem:[#allocation9] sm:$0xff] %v523_v14 }
 0x12a PF: > { %p949_p2 = scmp.le.s32.totalorder %s1361_s18, 0 }
 0x12c   : > { %528 = sbr.rel (%p949_p2) target bundleno = 553 (0x229), region = 60 }
 0x131   : > { %v1008_v52 = vld [vmem:[%s1515_s6 + $0x70] sm:$0xf]  ;;  %v1052_v15 = vld [vmem:[%s1515_s6 + $0x74] sm:$0xf0]  ;;  %v1051_v16 = vld [vmem:[%s1515_s6 + $0x74] sm:$0xf] }
 0x132   : > { %v1009_v17 = vor.u32 %v1052_v15, %v1008_v52  ;;  %v1010_v18 = vld [vmem:[%s1515_s6 + $0x78] sm:$0xf0]  ;;  %v1000_v19 = vld [vmem:[%s1515_s6 + $0x60] sm:$0xf]  ;;  %v1050_v20 = vld [vmem:[%s1515_s6 + $0x64] sm:$0xf0] }
 0x133   : > { %v1013_v21 = vor.u32 %v1051_v16, %v1010_v18  ;;  %v1049_v22 = vld [vmem:[%s1515_s6 + $0x64] sm:$0xf]  ;;  %v1002_v23 = vld [vmem:[%s1515_s6 + $0x68] sm:$0xf0]  ;;  %v1001_v24 = vor.u32 %v1050_v20, %v1000_v19  ;;  %v992_v26 = vld [vmem:[%s1515_s6 + $0x50] sm:$0xf] }
 0x134   : > { %627 = vmatpush.bf16.msra.mxu0 %v1009_v17  ;;  %v1005_v25 = vor.u32 %v1049_v22, %v1002_v23  ;;  %v1048_v27 = vld [vmem:[%s1515_s6 + $0x54] sm:$0xf0]  ;;  %v1047_v28 = vld [vmem:[%s1515_s6 + $0x54] sm:$0xf]  ;;  %v994_v29 = vld [vmem:[%s1515_s6 + $0x58] sm:$0xf0] }
 0x135   : > { %640 = vmatpush.bf16.msra.mxu1 %v1013_v21  ;;  %v993_v30 = vor.u32 %v1048_v27, %v992_v26  ;;  %v997_v31 = vor.u32 %v1047_v28, %v994_v29  ;;  %v984_v32 = vld [vmem:[%s1515_s6 + $0x40] sm:$0xf]  ;;  %v1046_v33 = vld [vmem:[%s1515_s6 + $0x44] sm:$0xf0]  ;;  %v1045_v34 = vld [vmem:[%s1515_s6 + $0x44] sm:$0xf] }
 0x136   : > { %v986_v35 = vld [vmem:[%s1515_s6 + $0x48] sm:$0xf0]  ;;  %v985_v36 = vor.u32 %v1046_v33, %v984_v32  ;;  %v976_v38 = vld [vmem:[%s1515_s6 + $0x30] sm:$0xf]  ;;  %v1044_v39 = vld [vmem:[%s1515_s6 + $0x34] sm:$0xf0] }
 0x137   : > { %v989_v37 = vor.u32 %v1045_v34, %v986_v35  ;;  %v1043_v40 = vld [vmem:[%s1515_s6 + $0x34] sm:$0xf]  ;;  %v978_v41 = vld [vmem:[%s1515_s6 + $0x38] sm:$0xf0]  ;;  %v977_v42 = vor.u32 %v1044_v39, %v976_v38  ;;  %v968_v44 = vld [vmem:[%s1515_s6 + $0x20] sm:$0xf] }
 0x138   : > { %628 = vmatpush.bf16.msra.mxu0 %v1001_v24  ;;  %v981_v43 = vor.u32 %v1043_v40, %v978_v41  ;;  %v1042_v45 = vld [vmem:[%s1515_s6 + $0x24] sm:$0xf0]  ;;  %v1041_v46 = vld [vmem:[%s1515_s6 + $0x24] sm:$0xf]  ;;  %v970_v47 = vld [vmem:[%s1515_s6 + $0x28] sm:$0xf0] }
 0x139   : > { %641 = vmatpush.bf16.msra.mxu1 %v1005_v25  ;;  %v969_v48 = vor.u32 %v1042_v45, %v968_v44  ;;  %v973_v49 = vor.u32 %v1041_v46, %v970_v47  ;;  %v960_v50 = vld [vmem:[%s1515_s6 + $0x10] sm:$0xf]  ;;  %v1040_v51 = vld [vmem:[%s1515_s6 + $0x14] sm:$0xf0]  ;;  %v1039_v53 = vld [vmem:[%s1515_s6 + $0x14] sm:$0xf] }
 0x13a   : > { %v962_v54 = vld [vmem:[%s1515_s6 + $0x18] sm:$0xf0]  ;;  %v961_v56 = vor.u32 %v1040_v51, %v960_v50  ;;  %v952_v58 = vld [vmem:[%s1515_s6] sm:$0xf]  ;;  %v1038_v59 = vld [vmem:[%s1515_s6 + $0x4] sm:$0xf0] }
 0x13b   : > { %v965_v57 = vor.u32 %v1039_v53, %v962_v54  ;;  %v1037_v60 = vld [vmem:[%s1515_s6 + $0x4] sm:$0xf]  ;;  %v954_v61 = vld [vmem:[%s1515_s6 + $0x8] sm:$0xf0]  ;;  %v953_v62 = vor.u32 %v1038_v59, %v952_v58 }
 0x13c   : > { %629 = vmatpush.bf16.msra.mxu0 %v993_v30  ;;  %v1570_v63 = vld [vmem:[#allocation9] sm:$0xff]  ;;  %v957_v55 = vor.u32 %v1037_v60, %v954_v61 }
 0x13d   : > { %642 = vmatpush.bf16.msra.mxu1 %v997_v31  ;;  %v530_v2 = vpack.c.bf16 %v1570_v63, %v1570_v63 }
 0x140   : > { %630 = vmatpush.bf16.msra.mxu0 %v985_v36 }
 0x141   : > { %643 = vmatpush.bf16.msra.mxu1 %v989_v37 }
 0x144   : > { %631 = vmatpush.bf16.msra.mxu0 %v977_v42 }
 0x145   : > { %644 = vmatpush.bf16.msra.mxu1 %v981_v43 }
 0x148   : > { %632 = vmatpush.bf16.msra.mxu0 %v969_v48 }
 0x149   : > { %645 = vmatpush.bf16.msra.mxu1 %v973_v49 }
 0x14c   : > { %633 = vmatpush.bf16.msra.mxu0 %v961_v56 }
 0x14d   : > { %646 = vmatpush.bf16.msra.mxu1 %v965_v57 }
 0x150   : > { %634 = vmatpush.bf16.msra.mxu0 %v953_v62 }
 0x151   : > { %647 = vmatpush.bf16.msra.mxu1 %v957_v55 }
 0x153   : > { %635 = vmatmul.bf16.vlgmr.msra.gmra.mxu0 %v530_v2 }
 0x154   : > { %648 = vmatmul.bf16.vlgmr.msra.gmra.mxu1 %v530_v2 }
 0x1d0   : > { %v1574_v3 = vpop.f32.mrf.mxu0 }
 0x1d1   : > { %v653_v4 = vrot.slane %v1574_v3, 4  ;;  %v667_v5 = vmul.f32 %v1574_v3, %v1574_v3  ;;  %v649_v6 = vpop.f32.mrf.mxu1 }
 0x1d2   : > { %v659_v7 = vrot.slane %v649_v6, 4  ;;  %v668_v8 = vmul.f32 %v649_v6, %v649_v6 }
 0x1d3   : > { %v654_v9 = vadd.f32 %v653_v4, %v1574_v3  ;;  %v669_v10 = vrot.slane %v667_v5, 4 }
 0x1d4   : > { %v660_v11 = vadd.f32 %v659_v7, %v649_v6  ;;  %v675_v12 = vrot.slane %v668_v8, 4 }
 0x1d5   : > { %v655_v13 = vrot.slane %v654_v9, 2  ;;  %v670_v14 = vadd.f32 %v669_v10, %v667_v5 }
 0x1d6   : > { %v661_v52 = vrot.slane %v660_v11, 2  ;;  %v676_v15 = vadd.f32 %v675_v12, %v668_v8 }
 0x1d7   : > { %v656_v16 = vadd.f32 %v655_v13, %v654_v9  ;;  %v671_v17 = vrot.slane %v670_v14, 2 }
 0x1d8   : > { %v662_v18 = vadd.f32 %v661_v52, %v660_v11  ;;  %v677_v19 = vrot.slane %v676_v15, 2  ;;  %v638_v20 = vpop.f32.mrf.mxu0 }
 0x1d9   : > { %v657_v21 = vrot.slane %v656_v16, 1  ;;  %v672_v22 = vadd.f32 %v671_v17, %v670_v14  ;;  %v651_v23 = vpop.f32.mrf.mxu1 }
 0x1da   : > { %v663_v24 = vrot.slane %v662_v18, 1  ;;  %v678_v25 = vadd.f32 %v677_v19, %v676_v15 }
 0x1db   : > { %v658_v26 = vadd.f32 %v657_v21, %v656_v16  ;;  %v673_v27 = vrot.slane %v672_v22, 1 }
 0x1dc   : > { %v664_v28 = vadd.f32 %v663_v24, %v662_v18  ;;  %v679_v29 = vrot.slane %v678_v25, 1 }
 0x1dd   : > { %v665_v30 = vmul.f32 0.125, %v658_v26  ;;  %v674_v31 = vadd.f32 %v673_v27, %v672_v22 }
 0x1de   : > { %v666_v32 = vmul.f32 0.125, %v664_v28  ;;  %v680_v33 = vadd.f32 %v679_v29, %v678_v25 }
 0x1df   : > { %v681_v34 = vmul.f32 0.125, %v674_v31  ;;  %v683_v35 = vmul.f32 %v665_v30, %v665_v30 }
 0x1e0   : > { %v682_v36 = vmul.f32 0.125, %v680_v33  ;;  %v684_v37 = vmul.f32 %v666_v32, %v666_v32 }
 0x1e1   : > { %v685_v38 = vsub.f32 %v681_v34, %v683_v35 }
 0x1e2   : > { %v686_v39 = vsub.f32 %v682_v36, %v684_v37 }
 0x1e3   : > { %v687_v40 = vmax.f32 %v685_v38, 0.0 }
 0x1e4   : > { %v688_v41 = vmax.f32 %v686_v39, 0.0 }
 0x1e5   : > { %v689_v43 = vadd.f32 1e-05, %v687_v40 }
 0x1e6   : > { %v690_v42 = vadd.f32 1e-05, %v688_v41 }
 0x1e7   : > { %vm697_vm13 = vweird.f32 %v689_v43 }
 0x1e8   : > { %1151 = vrsqrt.f32 %v690_v42  ;;  %vm707_vm11 = vweird.f32 %v690_v42 }
 0x1e9   : > { %1153 = vrsqrt.f32 %v689_v43 }
 0x1ee   : > { %v1152_v44 = vpop.eup %1151 }
 0x1ef   : > { %v702_v45 = vmul.f32 %v1152_v44, %v690_v42  ;;  %v1154_v47 = vpop.eup %1153  ;;  %vm708_vm10 = vweird.f32 %v1152_v44 }
 0x1f0   : > { %v692_v49 = vmul.f32 %v1154_v47, %v689_v43  ;;  %vm709_vm12 = vmor %vm707_vm11, %vm708_vm10  ;;  %vm698_vm14 = vweird.f32 %v1154_v47 }
 0x1f1   : > { %v703_v46 = vmul.f32 %v1152_v44, %v702_v45  ;;  %vm699_vm15 = vmor %vm697_vm13, %vm698_vm14 }
 0x1f2   : > { %v693_v53 = vmul.f32 %v1154_v47, %v692_v49 }
 0x1f3   : > { %v704_v48 = vmul.f32 0.5, %v703_v46 }
 0x1f4   : > { %v694_v58 = vmul.f32 0.5, %v693_v53 }
 0x1f5   : > { %v705_v50 = vsub.f32 1.5, %v704_v48 }
 0x1f6   : > { %v695_v62 = vsub.f32 1.5, %v694_v58 }
 0x1f7   : > { %v706_v51 = vmul.f32 %v1152_v44, %v705_v50 }
 0x1f8   : > { %v696_v5 = vmul.f32 %v1154_v47, %v695_v62 }
 0x1f9   : > { %v710_v54 = vsel %vm709_vm12, %v1152_v44, %v706_v51 }
 0x1fa   : > { %v712_v56 = vmul.f32 %v710_v54, %v1523_v1  ;;  %v700_v8 = vsel %vm699_vm15, %v1154_v47, %v696_v5 }
 0x1fb   : > { %v711_v9 = vmul.f32 %v700_v8, %v1521_v0 }
 0x1fc   : > { %v714_v57 = vmul.f32 %v712_v56, %v666_v32  ;;  %v724_v60 = vperm.slane %v712_v56, 0 }
 0x1fd   : > { %v713_v12 = vmul.f32 %v711_v9, %v665_v30  ;;  %v723_v52 = vperm.slane %v711_v9, 0 }
 0x1fe   : > { %v718_v59 = vrot.slane %v714_v57, 7  ;;  %v726_v55 = vmul.f32 %v724_v60, %v649_v6 }
 0x1ff   : > { %v717_v13 = vrot.slane %v713_v12, 7  ;;  %v725_v20 = vmul.f32 %v723_v52, %v1574_v3 }
 0x200   : > { %v722_v61 = vsub.f32 %v1523_v1, %v718_v59 }
 0x201   : > { %v721_v1 = vsub.f32 %v1521_v0, %v717_v13 }
 0x202   : > { %v728_v2 = vperm.slane %v722_v61, 1 }
 0x203   : > { %v727_v17 = vperm.slane %v721_v1, 1 }
 0x204   : > { %v730_v4 = vadd.f32 %v728_v2, %v726_v55 }
 0x205   : > { %v729_v23 = vadd.f32 %v727_v17, %v725_v20 }
 0x206   : > { %v1014_v7 = vmul.f32 -1.442695, %v730_v4 }
 0x208   : > { %1155 = vpow2.f32 %v1014_v7 }
 0x20e   : > { %v1156_v10 = vpop.eup %1155 }
 0x20f   : > { %v734_v11 = vadd.f32 1.0, %v1156_v10 }
 0x211   : > { %1157 = vrcp.f32 %v734_v11  ;;  %v746_v16 = vand.u32 2147483648, %v734_v11  ;;  %v744_v19 = vand.u32 2147483647, %v734_v11  ;;  %vm740_vm1 = vweird.f32 %v734_v11 }
 0x213   : > { %v747_v22 = vor.u32 1.1754944e-38, %v746_v16  ;;  %vm745_vm3 = vcmp.eq.f32.partialorder %v744_v19, 8.507059e+37 }
 0x217   : > { %v1158_v14 = vpop.eup %1157 }
 0x218   : > { %v736_v6 = vmul.f32 %v1158_v14, %v734_v11  ;;  %vm741_vm0 = vweird.f32 %v1158_v14 }
 0x219   : > { %vm742_vm2 = vmor %vm740_vm1, %vm741_vm0 }
 0x21a   : > { %v737_v15 = vsub.f32 1.0, %v736_v6 }
 0x21c   : > { %v738_v18 = vmul.f32 %v1158_v14, %v737_v15 }
 0x21e   : > { %v739_v21 = vadd.f32 %v1158_v14, %v738_v18 }
 0x220   : > { %v743_v24 = vsel %vm742_vm2, %v1158_v14, %v739_v21 }
 0x221   : > { %v748_v25 = vsel %vm745_vm3, %v747_v22, %v743_v24 }
 0x222   : > { %v750_v26 = vmul.f32 %v748_v25, %v729_v23 }
 0x224   : > { %v751_v0 = vadd.f32 %v750_v26, %v1570_v63 }
 0x226   : > { %v752_v27 = vmul.f32 0.70710677, %v751_v0 }
 0x228   : > { %753 = vst [vmem:[#allocation9] sm:$0xff] %v752_v27 }
 0x229 PF: > { %p1088_p3 = scmp.eq.s32.totalorder %s1430_s21, 3  ;;  %s764_s13 = sshll.u32 %s1612_s4, 4  ;;  %s765_s13 = int_to_ptr.hbm [resolvable:$true] %s764_s13 }
 0x22a   : > { %s1375_s26 = smov [#allocation9]  }
 0x22b   : > { %s762_s27 = sshll.u32 %s1375_s26, 4  ;;  %s763_s27 = int_to_ptr.vmem [resolvable:$true] %s762_s27 }
 0x22c   : > { %1066 = dma.vmem_to_hbm [thread:$0]  (%p1088_p3), %s763_s27, 128, %s765_s13, [#allocation4]  }
 0x22d   : > { %1344 = dma.done.wait (%p1088_p3), [#allocation4], 128  }
 0x22e   : > { %1346 = vsyncadd (%p1088_p3), [#allocation4], 4294967168 }
 0x22f PF: > { %s17_s20 = sadd.s32 1, %s1369_s20   ;;  %s1625_s30 = sld [smem:[#allocation15_spill]] }
 0x230   : > { %p14_p4 = scmp.ge.s32.totalorder %s17_s20, 6   ;;  %s1626_s21 = sld [smem:[#allocation14_spill]] }
 0x231   : > { %s1627_s15 = smov %s1353_s16  ;;  %s1628_s16 = smov %s1357_s17 }
 0x232   : > { %s1630_s18 = smov %s1365_s19  ;;  %16 = sbr.rel (!%p14_p4) target bundleno = 8 (0x8), region = 101 }
 0x235   : > { %s1629_s17 = smov %s1625_s30 }
 0x236   : > { %s1631_s19 = smov %s1626_s21 }
 0x237   :  { %778 = vsyncpa [#allocation3], 1 }
 0x238   :  { %780 = vsyncpa [#allocation3 + $0x1], 1 }
 0x239   :  { %781 = vsyncpa [#allocation6], 1 }
 0x23a   :  { %782 = vsyncpa [#allocation4], 1 }
 0x23b   :  { %784 = vsyncpa [#allocation4 + $0x1], 1 }

</bundles_post_ra>
